<compile_context>
chip_gen: v5e
topology: v5e:2x2
jax: 0.10.0
libtpu: 0.0.40
codegen_flags: <defaults>
</compile_context>

<pallas_src>
import math

import jax
import jax.numpy as jnp
from jax.experimental import pallas as pl
from jax.experimental.pallas import tpu as pltpu


# ----------------------------------------------------------------------------
# helpers
# ----------------------------------------------------------------------------
def _round_up(x, m):
    return ((x + m - 1) // m) * m


def _pick_tile(dim, candidates):
    """Pick the tile (from descending `candidates`) minimizing padded size;
    ties resolve to the largest tile (candidates are descending)."""
    best, best_pad = None, None
    for c in candidates:
        padded = _round_up(dim, c)
        if best_pad is None or padded < best_pad:
            best, best_pad = c, padded
    return best


def _sublane_multiple(dtype):
    """Packed-sublane row multiple: 8 for 4-byte, 16 for 2-byte, 32 for 1-byte."""
    itemsize = jnp.dtype(dtype).itemsize
    return {4: 8, 2: 16, 1: 32}.get(itemsize, 8)


# ----------------------------------------------------------------------------
# kernel
# ----------------------------------------------------------------------------
def linear_kernel(x_ref, w_ref, b_ref, o_ref, acc_ref):
    """One (tm, tn) output tile, accumulating over the K grid axis.

    x_ref: (tm, tk)   w_ref: (tk, tn)   b_ref: (1, tn)   o_ref: (tm, tn)
    acc_ref: (tm, tn) f32 VMEM scratch, persistent across the K axis.
    """
    k = pl.program_id(2)

    # Fold the bias into the accumulator init (no epilogue VPU add).
    @pl.when(k == 0)
    def _():
        acc_ref[...] = jnp.broadcast_to(
            b_ref[...].astype(jnp.float32), acc_ref.shape
        )

    # MXU matmul with f32 accumulation.
    acc_ref[...] += jnp.dot(
        x_ref[...], w_ref[...], preferred_element_type=jnp.float32
    )

    # Epilogue: cast + lane-dense store.
    @pl.when(k == pl.num_programs(2) - 1)
    def _():
        o_ref[...] = acc_ref[...].astype(o_ref.dtype)


# ----------------------------------------------------------------------------
# one-time weight preparation (do this at param-init / weight-load time)
# ----------------------------------------------------------------------------
def prepare_linear_params(weight, bias=None, *, param_dtype=None):
    """Pre-transpose and pre-pad PyTorch-layout params once.

    weight: (N, K) = (out_features, in_features)
    bias:   (N,) or None (treated as zeros)
    param_dtype: optional compute dtype for the weight (e.g. jnp.bfloat16).
    Returns a dict consumed by `linear_forward`.
    """
    N, K = weight.shape
    if bias is None:
        bias = jnp.zeros((N,), weight.dtype)
    assert bias.shape == (N,), "bias shape mismatch"

    if param_dtype is not None:
        weight = weight.astype(param_dtype)
    compute_dtype = weight.dtype

    # Tile sizes chosen from the weight's (K, N) only, so padding happens once.
    tn = _pick_tile(N, (512, 256, 128))
    tk = _pick_tile(K, (2048, 1024, 512, 256, 128))
    Np, Kp = _round_up(N, tn), _round_up(K, tk)

    w_t = weight.T  # (K, N): lane axis = output features -> unmasked stores
    if (Kp, Np) != (K, N):
        w_t = jnp.pad(w_t, ((0, Kp - K), (0, Np - N)))
    bias2d = jnp.pad(bias, (0, Np - N)).reshape(1, Np).astype(compute_dtype)

    return dict(
        w_t=w_t, bias2d=bias2d, N=N, K=K,
        tn=tn, tk=tk, Np=Np, Kp=Kp, compute_dtype=compute_dtype,
    )


# ----------------------------------------------------------------------------
# forward
# ----------------------------------------------------------------------------
def linear_forward(x, prepared):
    """y = x @ W.T + b using the pre-prepared (transposed + padded) params."""
    B, K = x.shape
    assert K == prepared["K"], "in_features mismatch"

    N = prepared["N"]
    tn, tk = prepared["tn"], prepared["tk"]
    Np, Kp = prepared["Np"], prepared["Kp"]
    w_t, bias2d = prepared["w_t"], prepared["bias2d"]
    compute_dtype = prepared["compute_dtype"]

    out_dtype = x.dtype
    if x.dtype != compute_dtype:
        x = x.astype(compute_dtype)

    # ---- M tile (dtype-aware sublane rounding, padding-minimizing choice) ----
    sub = _sublane_multiple(compute_dtype)
    if B < 128:
        tm = _round_up(B, sub)
    else:
        tm = _pick_tile(B, (512, 384, 256, 128))
    Bp = _round_up(B, tm)

    # ---- Megacore: ensure >= 2 blocks on a parallel axis when M collapses ----
    tn_run = tn
    if Bp // tm == 1:
        while Np // tn_run < 2 and tn_run >= 256 and tn_run % 256 == 0:
            tn_run //= 2  # still a 128-multiple dividing Np

    # ---- VMEM budget: stay well under v7x's 64 MiB per-TC VMEM ----
    in_isz = jnp.dtype(compute_dtype).itemsize
    out_isz = jnp.dtype(out_dtype).itemsize

    def vmem_need(tm_, tn_, tk_):
        return (2 * (tm_ * tk_ + tk_ * tn_ + tn_) * in_isz   # dbl-buffered in
                + 2 * tm_ * tn_ * out_isz                    # dbl-buffered out
                + tm_ * tn_ * 4)                             # f32 accumulator

    budget = 40 * 1024 * 1024
    while vmem_need(tm, tn_run, tk) > budget and tm > max(128, sub):
        tm = max(_round_up(tm // 2, sub), sub)
    Bp = _round_up(B, tm)

    # ---- Pad activations only (weight/bias were padded once at prepare) ----
    if (Bp, Kp) != (B, K):
        x = jnp.pad(x, ((0, Bp - B), (0, Kp - K)))

    grid = (Bp // tm, Np // tn_run, Kp // tk)

    # Scheduler hint with true (unpadded) problem cost.
    cost = pl.CostEstimate(
        flops=2 * B * N * K,
        transcendentals=0,
        bytes_accessed=(B * K + K * N + N) * in_isz + B * N * out_isz,
    )

    vmem_limit = min(max(2 * vmem_need(tm, tn_run, tk), 16 * 1024 * 1024),
                     48 * 1024 * 1024)

    y_pad = pl.pallas_call(
        linear_kernel,
        out_shape=jax.ShapeDtypeStruct((Bp, Np), out_dtype),
        grid_spec=pltpu.PrefetchScalarGridSpec(
            num_scalar_prefetch=0,
            grid=grid,
            in_specs=[
                pl.BlockSpec((tm, tk), lambda i, j, k: (i, k)),      # x tile
                pl.BlockSpec((tk, tn_run), lambda i, j, k: (k, j)),  # W.T tile
                pl.BlockSpec((1, tn_run), lambda i, j, k: (0, j)),   # bias tile
            ],
            out_specs=pl.BlockSpec((tm, tn_run), lambda i, j, k: (i, j)),
            scratch_shapes=[pltpu.VMEM((tm, tn_run), jnp.float32)],
        ),
        compiler_params=pltpu.CompilerParams(
            dimension_semantics=("parallel", "parallel", "arbitrary"),
            vmem_limit_bytes=vmem_limit,
        ),
        cost_estimate=cost,
    )(x, w_t, bias2d)

    if (Bp, Np) != (B, N):
        y_pad = y_pad[:B, :N]
    return y_pad


# ----------------------------------------------------------------------------
# init matching the PyTorch module
# ----------------------------------------------------------------------------
def init_linear_params(key, in_features, out_features, bias=True):
    """uniform(-1/sqrt(in_features), 1/sqrt(in_features)), like the module."""
    init_bound = 1.0 / math.sqrt(in_features)
    kw, kb = jax.random.split(key)
    weight = jax.random.uniform(
        kw, (out_features, in_features), jnp.float32,
        minval=-init_bound, maxval=init_bound)
    if bias:
        b = jax.random.uniform(
            kb, (out_features,), jnp.float32,
            minval=-init_bound, maxval=init_bound)
    else:
        b = jnp.zeros((out_features,), jnp.float32)
    return weight, b


# TODO(synk): only the forward pass is implemented; the module's backward /
# grad-accumulation bookkeeping (grad_weight, grad_bias) is out of scope.

if __name__ == "__main__":
    key = jax.random.PRNGKey(0)
    k_x, k_p = jax.random.split(key)

    # --- small shape consistent with the module (batch=8, in=32, out=16) ---
    batch, in_features, out_features = 8, 32, 16
    x = jax.random.normal(k_x, (batch, in_features), jnp.float32)
    weight, bias = init_linear_params(k_p, in_features, out_features, bias=True)

    prepared = prepare_linear_params(weight, bias)     # one-time prep
    y = jax.block_until_ready(linear_forward(x, prepared))
    y_ref = x @ weight.T + bias
    assert y.shape == (batch, out_features)
    assert jnp.allclose(y, y_ref, atol=1e-5, rtol=1e-5), "small mismatch"

    # --- a shape that actually tiles (multiple grid steps / megacore split) ---
    xb = jax.random.normal(k_x, (512, 1024), jnp.float32)
    wb, bb = init_linear_params(k_p, 1024, 768, bias=True)
    prep_b = prepare_linear_params(wb, bb)
    yb = jax.block_until_ready(linear_forward(xb, prep_b))
    yb_ref = xb @ wb.T + bb
    assert jnp.allclose(yb, yb_ref, atol=1e-4, rtol=1e-4), "tiled mismatch"

    # --- awkward shape exercising padding-minimizing tile selection ---
    xc = jax.random.normal(k_x, (300, 1000), jnp.float32)
    wc, bc = init_linear_params(k_p, 1000, 640, bias=True)
    prep_c = prepare_linear_params(wc, bc)
    yc = jax.block_until_ready(linear_forward(xc, prep_c))
    yc_ref = xc @ wc.T + bc
    assert jnp.allclose(yc, yc_ref, atol=1e-4, rtol=1e-4), "padded mismatch"

    # --- optional bf16 compute path (native MXU format, f32 accumulation) ---
    prep_bf16 = prepare_linear_params(wb, bb, param_dtype=jnp.bfloat16)
    yh = jax.block_until_ready(
        linear_forward(xb.astype(jnp.bfloat16), prep_bf16))
    assert jnp.allclose(yh.astype(jnp.float32), yb_ref, atol=1e-1, rtol=1e-1), \
        "bf16 mismatch"

    print("KERNEL_OK")
</pallas_src>

<mosaic_0001>
module attributes {stable_mosaic.version = 11 : i64} {
  func.func @linear_kernel(%arg0: i32, %arg1: i32, %arg2: i32, %arg3: memref<8x128xf32, #tpu.memory_space<vmem>>, %arg4: memref<128x128xf32, #tpu.memory_space<vmem>>, %arg5: memref<1x128xf32, #tpu.memory_space<vmem>>, %arg6: memref<8x128xf32, #tpu.memory_space<vmem>>, %arg7: memref<8x128xf32, #tpu.memory_space<vmem>>) attributes {dimension_semantics = [#tpu.dimension_semantics<parallel>, #tpu.dimension_semantics<parallel>, #tpu.dimension_semantics<arbitrary>], iteration_bounds = array<i64: 1, 1, 1>, scalar_prefetch = 0 : i64, scratch_operands = 1 : i64, tpu.core_type = #tpu.core_type<tc>, window_params = [{transform_indices = @transform_0, window_bounds = array<i64: 8, 128>}, {transform_indices = @transform_1, window_bounds = array<i64: 128, 128>}, {transform_indices = @transform_2, window_bounds = array<i64: 1, 128>}, {transform_indices = @transform_3, window_bounds = array<i64: 8, 128>}]} {
    %c0_i32 = arith.constant 0 : i32
    %0 = arith.cmpi eq, %arg2, %c0_i32 : i32
    %1 = arith.extui %0 : i1 to i32
    %c0_i32_0 = arith.constant 0 : i32
    %2 = arith.cmpi ne, %1, %c0_i32_0 : i32
    scf.if %2 {
      %c0_10 = arith.constant 0 : index
      %c0_11 = arith.constant 0 : index
      %12 = vector.load %arg5[%c0_10, %c0_11] : memref<1x128xf32, #tpu.memory_space<vmem>>, vector<1x128xf32>
      %13 = vector.shape_cast %12 : vector<1x128xf32> to vector<1x128xf32>
      %14 = vector.broadcast %13 : vector<1x128xf32> to vector<8x128xf32>
      %c0_12 = arith.constant 0 : index
      %c0_13 = arith.constant 0 : index
      %15 = vector.load %arg7[%c0_12, %c0_13] : memref<8x128xf32, #tpu.memory_space<vmem>>, vector<8x128xf32>
      tpu.vector_store %arg7[%c0_12, %c0_13], %14 {strides = array<i32>} : memref<8x128xf32, #tpu.memory_space<vmem>>, vector<8x128xf32>,
    } else {
    }
    %c0 = arith.constant 0 : index
    %c0_1 = arith.constant 0 : index
    %3 = vector.load %arg7[%c0, %c0_1] : memref<8x128xf32, #tpu.memory_space<vmem>>, vector<8x128xf32>
    %c0_2 = arith.constant 0 : index
    %c0_3 = arith.constant 0 : index
    %4 = vector.load %arg3[%c0_2, %c0_3] : memref<8x128xf32, #tpu.memory_space<vmem>>, vector<8x128xf32>
    %c0_4 = arith.constant 0 : index
    %c0_5 = arith.constant 0 : index
    %5 = vector.load %arg4[%c0_4, %c0_5] : memref<128x128xf32, #tpu.memory_space<vmem>>, vector<128x128xf32>
    %cst = arith.constant dense<0.000000e+00> : vector<8x128xf32>
    %6 = tpu.matmul %4, %5, %cst {dimension_numbers = #tpu.dot_dimension_numbers<[1], [0], [0], [1], [0, 0, 1, 1], [], []>} : vector<8x128xf32>, vector<128x128xf32>, vector<8x128xf32> -> vector<8x128xf32>
    %7 = arith.addf %3, %6 : vector<8x128xf32>
    %c0_6 = arith.constant 0 : index
    %c0_7 = arith.constant 0 : index
    %8 = vector.load %arg7[%c0_6, %c0_7] : memref<8x128xf32, #tpu.memory_space<vmem>>, vector<8x128xf32>
    tpu.vector_store %arg7[%c0_6, %c0_7], %7 {strides = array<i32>} : memref<8x128xf32, #tpu.memory_space<vmem>>, vector<8x128xf32>,
    %c0_i32_8 = arith.constant 0 : i32
    %9 = arith.cmpi eq, %arg2, %c0_i32_8 : i32
    %10 = arith.extui %9 : i1 to i32
    %c0_i32_9 = arith.constant 0 : i32
    %11 = arith.cmpi ne, %10, %c0_i32_9 : i32
    scf.if %11 {
      %c0_10 = arith.constant 0 : index
      %c0_11 = arith.constant 0 : index
      %12 = vector.load %arg7[%c0_10, %c0_11] : memref<8x128xf32, #tpu.memory_space<vmem>>, vector<8x128xf32>
      %c0_12 = arith.constant 0 : index
      %c0_13 = arith.constant 0 : index
      %13 = vector.load %arg6[%c0_12, %c0_13] : memref<8x128xf32, #tpu.memory_space<vmem>>, vector<8x128xf32>
      tpu.vector_store %arg6[%c0_12, %c0_13], %12 {strides = array<i32>} : memref<8x128xf32, #tpu.memory_space<vmem>>, vector<8x128xf32>,
    } else {
    }
    return
  }
  func.func @transform_0(%arg0: i32, %arg1: i32, %arg2: i32) -> (i32, i32) {
    %c0_i32 = arith.constant 0 : i32
    return %arg0, %arg2 : i32, i32
  }
  func.func @transform_1(%arg0: i32, %arg1: i32, %arg2: i32) -> (i32, i32) {
    %c0_i32 = arith.constant 0 : i32
    return %arg2, %arg1 : i32, i32
  }
  func.func @transform_2(%arg0: i32, %arg1: i32, %arg2: i32) -> (i32, i32) {
    %c0_i32 = arith.constant 0 : i32
    %c0_i32_0 = arith.constant 0 : i32
    return %c0_i32, %arg1 : i32, i32
  }
  func.func @transform_3(%arg0: i32, %arg1: i32, %arg2: i32) -> (i32, i32) {
    %c0_i32 = arith.constant 0 : i32
    return %arg0, %arg1 : i32, i32
  }
}

</mosaic_0001>

<bundles_post_ra>
// kernel: tpu_custom_call.1
= control target key start
LH: loop header
LB: loop body
LE: loop exit
PB: predicated region body
PF: predicated region fallthrough
CT: control target
= control target key end

     0   :  { %8 = vsyncpa [#allocation4], 0  ;;  %s238_s0 = inlined_call_operand.hbm [shape: f32[8,128], index: 0, kind: input, shape index: {}]   ;;  %s239_s1 = inlined_call_operand.hbm [shape: f32[128,128], index: 1, kind: input, shape index: {}]   ;;  %s240_s2 = inlined_call_operand.vmem [shape: f32[1,128], index: 2, kind: input, shape index: {}]   ;;  %s241_s3 = inlined_call_operand.hbm [shape: f32[8,128], index: 3, kind: output, shape index: {}]  }
   0x1   :  { %9 = vsyncpa [#allocation7], 0 }
   0x2   :  { %10 = vsyncpa [#allocation5], 0  ;;  %s16_s14 = sshll.u32 %s238_s0, 4  ;;  %s201_s15 = smov [#allocation3]   ;;  %s17_s14 = int_to_ptr.hbm [resolvable:$true] %s16_s14 }
   0x3   :  { %s18_s16 = sshll.u32 %s201_s15, 4  ;;  %s26_s19 = sshll.u32 %s239_s1, 4  ;;  %s19_s16 = int_to_ptr.vmem [resolvable:$true] %s18_s16  ;;  %s27_s19 = int_to_ptr.hbm [resolvable:$true] %s26_s19 }
   0x4   :  { %21 = dma.hbm_to_vmem [thread:$0]  %s17_s14, 128, %s19_s16, [#allocation4]  }
   0x5   :  { %s202_s20 = smov [#allocation6]   ;;  %s203_s22 = smov 128  }
   0x6   :  { %s28_s21 = sshll.u32 %s202_s20, 4  ;;  %s204_s23 = smov 8   ;;  %s29_s21 = int_to_ptr.vmem [resolvable:$true] %s28_s21 }
   0x7   :  { %34 = dma.hbm_to_vmem [thread:$0]  %s27_s19, 2048, %s29_s21, [#allocation7], %s203_s22, %s203_s22, %s204_s23  }
   0x8   :  { %195 = dma.done.wait [#allocation4], 128  }
   0x9   :  { %196 = vsyncadd [#allocation4], 4294967168 }
   0xa   :  { %197 = dma.done.wait [#allocation7], 2048  }
   0xb   :  { %198 = vsyncadd [#allocation7], 4294965248  ;;  %v71_v0 = vld [vmem:[#allocation6 + $0x78] sm:$0xff]  ;;  %v70_v1 = vld [vmem:[#allocation6 + $0x70] sm:$0xff]  ;;  %s205_s24 = smov [#allocation8]   ;;  %s106_s28 = sshll.u32 %s241_s3, 4  ;;  %s107_s28 = int_to_ptr.hbm [resolvable:$true] %s106_s28 }
   0xc   :  { %72 = vmatpush.msra.mxu0 %v71_v0  ;;  %v69_v2 = vld [vmem:[#allocation6 + $0x68] sm:$0xff]  ;;  %v68_v3 = vld [vmem:[#allocation6 + $0x60] sm:$0xff]  ;;  %v67_v4 = vld [vmem:[#allocation6 + $0x58] sm:$0xff]  ;;  %s104_s25 = sshll.u32 %s205_s24, 4  ;;  %s105_s25 = int_to_ptr.vmem [resolvable:$true] %s104_s25 }
   0xd   :  { %v66_v5 = vld [vmem:[#allocation6 + $0x50] sm:$0xff]  ;;  %v65_v6 = vld [vmem:[#allocation6 + $0x48] sm:$0xff]  ;;  %v64_v7 = vld [vmem:[#allocation6 + $0x40] sm:$0xff] }
   0xe   :  { %73 = vmatpush.msra.mxu0 %v70_v1  ;;  %v63_v8 = vld [vmem:[#allocation6 + $0x38] sm:$0xff]  ;;  %v62_v9 = vld [vmem:[#allocation6 + $0x30] sm:$0xff]  ;;  %v61_v10 = vld [vmem:[#allocation6 + $0x28] sm:$0xff] }
   0xf   :  { %v60_v11 = vld [vmem:[#allocation6 + $0x20] sm:$0xff]  ;;  %v59_v12 = vld [vmem:[#allocation6 + $0x18] sm:$0xff]  ;;  %v58_v13 = vld [vmem:[#allocation6 + $0x10] sm:$0xff] }
  0x10   :  { %74 = vmatpush.msra.mxu0 %v69_v2  ;;  %v57_v14 = vld [vmem:[#allocation6 + $0x8] sm:$0xff]  ;;  %v56_v15 = vld [vmem:[#allocation6] sm:$0xff]  ;;  %v55_v16 = vld [vmem:[#allocation3] sm:$0xff] }
  0x11   :  { %v122_v17 = vld [vmem:[%s240_s2] ss:$0 sm:$0xff] }
  0x12   :  { %75 = vmatpush.msra.mxu0 %v68_v3 }
  0x14   :  { %76 = vmatpush.msra.mxu0 %v67_v4 }
  0x16   :  { %77 = vmatpush.msra.mxu0 %v66_v5 }
  0x18   :  { %78 = vmatpush.msra.mxu0 %v65_v6 }
  0x1a   :  { %79 = vmatpush.msra.mxu0 %v64_v7 }
  0x1c   :  { %80 = vmatpush.msra.mxu0 %v63_v8 }
  0x1e   :  { %81 = vmatpush.msra.mxu0 %v62_v9 }
  0x20   :  { %82 = vmatpush.msra.mxu0 %v61_v10 }
  0x22   :  { %83 = vmatpush.msra.mxu0 %v60_v11 }
  0x24   :  { %84 = vmatpush.msra.mxu0 %v59_v12 }
  0x26   :  { %85 = vmatpush.msra.mxu0 %v58_v13 }
  0x28   :  { %86 = vmatpush.msra.mxu0 %v57_v14 }
  0x2a   :  { %87 = vmatpush.msra.mxu0 %v56_v15 }
  0x2b   :  { %88 = vmatmul.f32.vlgmr.msra.gmra.mxu0 %v55_v16 }
  0xa8   :  { %v89_v18 = vpop.f32.mrf.mxu0 }
  0xa9   :  { %v92_v19 = vadd.f32 %v122_v17, %v89_v18 }
  0xab   :  { %98 = vst [vmem:[#allocation8] sm:$0xff] %v92_v19 }
  0xac   :  { %109 = dma.vmem_to_hbm [thread:$0]  %s105_s25, 128, %s107_s28, [#allocation5]  }
  0xad   :  { %199 = dma.done.wait [#allocation5], 128  }
  0xae   :  { %200 = vsyncadd [#allocation5], 4294967168 }
  0xaf   :  { %114 = vsyncpa [#allocation4], 1 }
  0xb0   :  { %115 = vsyncpa [#allocation7], 1 }
  0xb1   :  { %116 = vsyncpa [#allocation5], 1 }

</bundles_post_ra>
